<compile_context>
chip_gen: v7x
topology: tpu7x:2x2x1
jax: 0.10.0
libtpu: 0.0.40
codegen_flags: <defaults>
</compile_context>

<pallas_src>
import jax
import jax.numpy as jnp
from jax.experimental import pallas as pl
from jax.experimental.pallas import tpu as pltpu


def _block_kernel(x_ref, w1_ref, b1_ref, w2_ref, b2_ref, o_ref, pad_ref):
    # x_ref: (NB, H, W, C) -- NB images per grid step, channels on lanes.
    NB, H, W, C = x_ref.shape
    M = NB * H * W
    mm_dtype = w1_ref.dtype                       # matmul-input dtype (bf16 or f32)

    # ---- conv1 (1x1): one channel matmul on the MXU (BN1 scale folded into w1) ----
    y1 = jnp.dot(x_ref[...].reshape(M, C).astype(mm_dtype), w1_ref[...],
                 preferred_element_type=jnp.float32)
    # ---- bn1 bias + ReLU in f32 on the VPU ----
    y1 = jnp.maximum(y1 + b1_ref[...], 0.0)

    # ---- conv2 (3x3, stride 1, pad 1): padded scratch + 9 accumulated K=C matmuls ----
    # Zero only the 1-pixel border (interior is fully overwritten below).  This is
    # unconditional so it stays correct when the 'parallel' axis is split across
    # TensorCores (a core's first iteration may not be grid step 0).
    z_row = jnp.zeros((NB, 1, W + 2, C), pad_ref.dtype)
    pad_ref[:, 0:1, :, :] = z_row
    pad_ref[:, H + 1:H + 2, :, :] = z_row
    z_col = jnp.zeros((NB, H + 2, 1, C), pad_ref.dtype)
    pad_ref[:, :, 0:1, :] = z_col
    pad_ref[:, :, W + 1:W + 2, :] = z_col
    pad_ref[:, 1:H + 1, 1:W + 1, :] = y1.reshape(NB, H, W, C).astype(pad_ref.dtype)

    # Nine K=C MXU matmuls accumulated in f32; each window is sliced from pad_ref
    # directly at the point of use (no materialized plane temporaries, no im2col
    # scratch).  BN2 scale is already folded into w2.
    acc = jnp.zeros((M, C), jnp.float32)
    for dh in range(3):
        for dw in range(3):
            win = pad_ref[:, dh:dh + H, dw:dw + W, :].reshape(M, C)
            acc = acc + jnp.dot(win, w2_ref[dh * 3 + dw],
                                preferred_element_type=jnp.float32)

    # ---- bn2 bias + residual add + ReLU (residual read late to cut live VMEM) ----
    res = x_ref[...].reshape(M, C).astype(jnp.float32)
    out = jnp.maximum(acc + b2_ref[...] + res, 0.0)
    o_ref[...] = out.reshape(NB, H, W, C).astype(o_ref.dtype)


def _default_images_per_step(N, H, W, C, matmul_dtype, vmem_budget_bytes):
    """Pick images-per-step from a (lane-padded) VMEM estimate AND a minimum grid depth."""
    lane = 128
    cp = -(-C // lane) * lane                     # lane-padded channel width in VMEM
    f32 = 4
    mm = jnp.dtype(matmul_dtype).itemsize
    per_image = (2 * H * W * cp * f32             # x block, double-buffered
                 + 2 * H * W * cp * f32           # out block, double-buffered
                 + (H + 2) * (W + 2) * cp * mm    # padded-activation scratch
                 + 3 * H * W * cp * f32)          # y1 / acc / window temporaries margin
    nb_vmem = max(1, vmem_budget_bytes // per_image)
    nb_grid = max(1, N // 8)                      # aim for >= ~8 grid steps (pipelining,
                                                  # >= 4 steps per v7x TensorCore)
    nb = int(min(nb_vmem, nb_grid, N))
    while N % nb:                                 # nb must divide the batch
        nb -= 1
    return nb


def block_forward(x_nhwc, w1, w2, scale1, bias1, scale2, bias2, *,
                  images_per_step=None, matmul_dtype=jnp.bfloat16,
                  vmem_budget_bytes=20 * 1024 * 1024,
                  vmem_limit_bytes=48 * 1024 * 1024):
    """Residual block forward.  x_nhwc: (N, H, W, C) float32 -> (N, H, W, C).

    Assumes stride=1, no downsample, and inplanes == planes.
    w1: (Cin, Cout); w2: (kh, kw, Cin, Cout); scale/bias: folded inference BN."""
    N, H, W, C = x_nhwc.shape
    assert w1.shape == (C, C) and w2.shape == (3, 3, C, C), \
        "kernel assumes inplanes == planes, stride=1, no downsample"

    if images_per_step is None:
        images_per_step = _default_images_per_step(
            N, H, W, C, matmul_dtype, vmem_budget_bytes)
    nb = images_per_step
    assert N % nb == 0, "batch must be divisible by images_per_step"
    grid_n = N // nb

    # Fold BN scales into the conv weights IN F32, then cast to the matmul dtype
    # (avoids double rounding when matmul_dtype is bf16).  Only biases stay in-kernel.
    w1f = (w1.astype(jnp.float32) * scale1.reshape(1, C)).astype(matmul_dtype)
    w2f = (w2.astype(jnp.float32) * scale2.reshape(1, 1, 1, C)) \
        .reshape(9, C, C).astype(matmul_dtype)            # tap t = dh*3 + dw
    b1 = bias1.reshape(1, C).astype(jnp.float32)
    b2 = bias2.reshape(1, C).astype(jnp.float32)

    itemsize = jnp.dtype(matmul_dtype).itemsize
    flops = 2 * N * H * W * C * (C + 9 * C) + 8 * N * H * W * C
    bytes_accessed = (4 * 2 * N * H * W * C            # input + output (f32)
                      + itemsize * 10 * C * C          # folded conv weights
                      + 4 * 2 * C)                     # folded BN biases

    return pl.pallas_call(
        _block_kernel,
        out_shape=jax.ShapeDtypeStruct((N, H, W, C), x_nhwc.dtype),
        grid_spec=pltpu.PrefetchScalarGridSpec(
            num_scalar_prefetch=0,
            grid=(grid_n,),
            in_specs=[
                pl.BlockSpec((nb, H, W, C), lambda n: (n, 0, 0, 0)),   # x
                pl.BlockSpec((C, C), lambda n: (0, 0)),                # w1 * bn1 scale
                pl.BlockSpec((1, C), lambda n: (0, 0)),                # bn1 bias
                pl.BlockSpec((9, C, C), lambda n: (0, 0, 0)),          # w2 * bn2 scale
                pl.BlockSpec((1, C), lambda n: (0, 0)),                # bn2 bias
            ],
            out_specs=pl.BlockSpec((nb, H, W, C), lambda n: (n, 0, 0, 0)),
            scratch_shapes=[
                pltpu.VMEM((nb, H + 2, W + 2, C), matmul_dtype),       # padded y1 plane
            ],
        ),
        compiler_params=pltpu.CompilerParams(
            dimension_semantics=("parallel",),
            vmem_limit_bytes=vmem_limit_bytes),
        cost_estimate=pl.CostEstimate(
            flops=flops, transcendentals=0, bytes_accessed=bytes_accessed),
    )(x_nhwc, w1f, b1, w2f, b2)


def _reference(x_nhwc, w1, w2, scale1, bias1, scale2, bias2):
    """Pure-JAX f32 reference (same NHWC math as the PyTorch module, inference BN)."""
    y1 = jnp.einsum("nhwc,cd->nhwd", x_nhwc, w1)
    y1 = jnp.maximum(y1 * scale1 + bias1, 0.0)
    N, H, W, C = x_nhwc.shape
    y1p = jnp.pad(y1, ((0, 0), (1, 1), (1, 1), (0, 0)))
    acc = jnp.zeros_like(y1)
    for dh in range(3):
        for dw in range(3):
            acc = acc + jnp.einsum("nhwc,cd->nhwd",
                                   y1p[:, dh:dh + H, dw:dw + W, :], w2[dh, dw])
    y2 = acc * scale2 + bias2
    return jnp.maximum(y2 + x_nhwc, 0.0)


if __name__ == "__main__":
    key = jax.random.PRNGKey(0)
    k_x, k_w1, k_w2, k_g1, k_b1, k_g2, k_b2, k_m, k_v = jax.random.split(key, 9)

    N, C, H, W = 2, 16, 8, 8          # inplanes = planes = 16, stride = 1
    eps = 1e-5

    # PyTorch-style NCHW input -> NHWC for the kernel
    x_nchw = jax.random.normal(k_x, (N, C, H, W), dtype=jnp.float32)
    x_nhwc = jnp.transpose(x_nchw, (0, 2, 3, 1))

    # Conv weights carried as w1: (Cin, Cout) and w2: (kh, kw, Cin, Cout).
    w1 = jax.random.normal(k_w1, (C, C), dtype=jnp.float32) * 0.1
    w2 = jax.random.normal(k_w2, (3, 3, C, C), dtype=jnp.float32) * 0.1

    # BatchNorm (inference): running stats + learned gamma/beta, folded to scale/bias.
    gamma1 = 1.0 + 0.1 * jax.random.normal(k_g1, (C,), dtype=jnp.float32)
    beta1 = 0.1 * jax.random.normal(k_b1, (C,), dtype=jnp.float32)
    gamma2 = 1.0 + 0.1 * jax.random.normal(k_g2, (C,), dtype=jnp.float32)
    beta2 = 0.1 * jax.random.normal(k_b2, (C,), dtype=jnp.float32)
    run_mean = 0.1 * jax.random.normal(k_m, (C,), dtype=jnp.float32)
    run_var = 1.0 + 0.1 * jnp.abs(jax.random.normal(k_v, (C,), dtype=jnp.float32))

    scale1 = gamma1 / jnp.sqrt(run_var + eps)
    bias1 = beta1 - run_mean * scale1
    scale2 = gamma2 / jnp.sqrt(run_var + eps)
    bias2 = beta2 - run_mean * scale2

    ref = _reference(x_nhwc, w1, w2, scale1, bias1, scale2, bias2)

    # f32 matmul path: bit-tight vs. the PyTorch-style f32 reference.
    out_f32 = block_forward(x_nhwc, w1, w2, scale1, bias1, scale2, bias2,
                            matmul_dtype=jnp.float32)
    out_f32 = jax.block_until_ready(out_f32)
    assert jnp.allclose(out_f32, ref, atol=1e-4, rtol=1e-4), "f32 mismatch vs reference"

    # Default (bf16 MXU inputs, f32 accumulation) path: inference-grade tolerance.
    out_bf16 = block_forward(x_nhwc, w1, w2, scale1, bias1, scale2, bias2)
    out_bf16 = jax.block_until_ready(out_bf16)
    assert jnp.allclose(out_bf16, ref, atol=7.5e-2, rtol=5e-2), "bf16 mismatch vs reference"

    # Back to NCHW to match the PyTorch module's output convention.
    out_nchw = jnp.transpose(out_f32, (0, 3, 1, 2))
    jax.block_until_ready(out_nchw)
    print("KERNEL_OK")
</pallas_src>

<mosaic_0001>
module attributes {stable_mosaic.version = 11 : i64} {
  func.func @_block_kernel(%arg0: i32, %arg1: memref<1x8x8x16xf32, #tpu.memory_space<vmem>>, %arg2: memref<16x16xf32, #tpu.memory_space<vmem>>, %arg3: memref<1x16xf32, #tpu.memory_space<vmem>>, %arg4: memref<9x16x16xf32, #tpu.memory_space<vmem>>, %arg5: memref<1x16xf32, #tpu.memory_space<vmem>>, %arg6: memref<1x8x8x16xf32, #tpu.memory_space<vmem>>, %arg7: memref<1x10x10x16xf32, #tpu.memory_space<vmem>>) attributes {dimension_semantics = [#tpu.dimension_semantics<parallel>], iteration_bounds = array<i64: 2>, scalar_prefetch = 0 : i64, scratch_operands = 1 : i64, tpu.core_type = #tpu.core_type<tc>, window_params = [{transform_indices = @transform_0, window_bounds = array<i64: 1, 8, 8, 16>}, {pipeline_mode = #tpu.pipeline_mode<synchronous>, transform_indices = @transform_1, window_bounds = array<i64: 16, 16>}, {pipeline_mode = #tpu.pipeline_mode<synchronous>, transform_indices = @transform_2, window_bounds = array<i64: 1, 16>}, {pipeline_mode = #tpu.pipeline_mode<synchronous>, transform_indices = @transform_3, window_bounds = array<i64: 9, 16, 16>}, {pipeline_mode = #tpu.pipeline_mode<synchronous>, transform_indices = @transform_4, window_bounds = array<i64: 1, 16>}, {transform_indices = @transform_5, window_bounds = array<i64: 1, 8, 8, 16>}]} {
    %c0 = arith.constant 0 : index
    %c0_0 = arith.constant 0 : index
    %c0_1 = arith.constant 0 : index
    %c0_2 = arith.constant 0 : index
    %0 = vector.load %arg1[%c0, %c0_0, %c0_1, %c0_2] : memref<1x8x8x16xf32, #tpu.memory_space<vmem>>, vector<1x8x8x16xf32>
    %1 = vector.shape_cast %0 : vector<1x8x8x16xf32> to vector<64x16xf32>
    %c0_3 = arith.constant 0 : index
    %c0_4 = arith.constant 0 : index
    %2 = vector.load %arg2[%c0_3, %c0_4] : memref<16x16xf32, #tpu.memory_space<vmem>>, vector<16x16xf32>
    %cst = arith.constant dense<0.000000e+00> : vector<64x16xf32>
    %3 = tpu.matmul %1, %2, %cst {dimension_numbers = #tpu.dot_dimension_numbers<[1], [0], [0], [1], [0, 0, 1, 1], [], []>} : vector<64x16xf32>, vector<16x16xf32>, vector<64x16xf32> -> vector<64x16xf32>
    %c0_5 = arith.constant 0 : index
    %c0_6 = arith.constant 0 : index
    %4 = vector.load %arg3[%c0_5, %c0_6] : memref<1x16xf32, #tpu.memory_space<vmem>>, vector<1x16xf32>
    %5 = vector.broadcast %4 : vector<1x16xf32> to vector<64x16xf32>
    %6 = arith.addf %3, %5 : vector<64x16xf32>
    %cst_7 = arith.constant 0.000000e+00 : f32
    %7 = vector.broadcast %cst_7 : f32 to vector<64x16xf32>
    %8 = arith.maximumf %6, %7 : vector<64x16xf32>
    %cst_8 = arith.constant 0.000000e+00 : f32
    %9 = vector.broadcast %cst_8 : f32 to vector<1x1x10x16xf32>
    %c0_9 = arith.constant 0 : index
    %c0_10 = arith.constant 0 : index
    %c0_11 = arith.constant 0 : index
    %c0_12 = arith.constant 0 : index
    %10 = vector.load %arg7[%c0_9, %c0_10, %c0_11, %c0_12] : memref<1x10x10x16xf32, #tpu.memory_space<vmem>>, vector<1x1x10x16xf32>
    tpu.vector_store %arg7[%c0_9, %c0_10, %c0_11, %c0_12], %9 {strides = array<i32>} : memref<1x10x10x16xf32, #tpu.memory_space<vmem>>, vector<1x1x10x16xf32>,
    %c0_13 = arith.constant 0 : index
    %c9 = arith.constant 9 : index
    %c0_14 = arith.constant 0 : index
    %c0_15 = arith.constant 0 : index
    %11 = vector.load %arg7[%c0_13, %c9, %c0_14, %c0_15] : memref<1x10x10x16xf32, #tpu.memory_space<vmem>>, vector<1x1x10x16xf32>
    tpu.vector_store %arg7[%c0_13, %c9, %c0_14, %c0_15], %9 {strides = array<i32>} : memref<1x10x10x16xf32, #tpu.memory_space<vmem>>, vector<1x1x10x16xf32>,
    %cst_16 = arith.constant 0.000000e+00 : f32
    %12 = vector.broadcast %cst_16 : f32 to vector<1x10x1x16xf32>
    %c0_17 = arith.constant 0 : index
    %c0_18 = arith.constant 0 : index
    %c0_19 = arith.constant 0 : index
    %c0_20 = arith.constant 0 : index
    %13 = vector.load %arg7[%c0_17, %c0_18, %c0_19, %c0_20] : memref<1x10x10x16xf32, #tpu.memory_space<vmem>>, vector<1x10x1x16xf32>
    tpu.vector_store %arg7[%c0_17, %c0_18, %c0_19, %c0_20], %12 {strides = array<i32>} : memref<1x10x10x16xf32, #tpu.memory_space<vmem>>, vector<1x10x1x16xf32>,
    %c0_21 = arith.constant 0 : index
    %c0_22 = arith.constant 0 : index
    %c9_23 = arith.constant 9 : index
    %c0_24 = arith.constant 0 : index
    %14 = vector.load %arg7[%c0_21, %c0_22, %c9_23, %c0_24] : memref<1x10x10x16xf32, #tpu.memory_space<vmem>>, vector<1x10x1x16xf32>
    tpu.vector_store %arg7[%c0_21, %c0_22, %c9_23, %c0_24], %12 {strides = array<i32>} : memref<1x10x10x16xf32, #tpu.memory_space<vmem>>, vector<1x10x1x16xf32>,
    %15 = vector.shape_cast %8 : vector<64x16xf32> to vector<1x8x8x16xf32>
    %c0_25 = arith.constant 0 : index
    %c1 = arith.constant 1 : index
    %c1_26 = arith.constant 1 : index
    %c0_27 = arith.constant 0 : index
    %16 = vector.load %arg7[%c0_25, %c1, %c1_26, %c0_27] : memref<1x10x10x16xf32, #tpu.memory_space<vmem>>, vector<1x8x8x16xf32>
    tpu.vector_store %arg7[%c0_25, %c1, %c1_26, %c0_27], %15 {strides = array<i32>} : memref<1x10x10x16xf32, #tpu.memory_space<vmem>>, vector<1x8x8x16xf32>,
    %cst_28 = arith.constant 0.000000e+00 : f32
    %17 = vector.broadcast %cst_28 : f32 to vector<64x16xf32>
    %c0_29 = arith.constant 0 : index
    %c0_30 = arith.constant 0 : index
    %c0_31 = arith.constant 0 : index
    %c0_32 = arith.constant 0 : index
    %18 = vector.load %arg7[%c0_29, %c0_30, %c0_31, %c0_32] : memref<1x10x10x16xf32, #tpu.memory_space<vmem>>, vector<1x8x8x16xf32>
    %19 = vector.shape_cast %18 : vector<1x8x8x16xf32> to vector<64x16xf32>
    %c0_33 = arith.constant 0 : index
    %c0_34 = arith.constant 0 : index
    %c0_35 = arith.constant 0 : index
    %20 = vector.load %arg4[%c0_33, %c0_34, %c0_35] : memref<9x16x16xf32, #tpu.memory_space<vmem>>, vector<1x16x16xf32>
    %21 = vector.shape_cast %20 : vector<1x16x16xf32> to vector<16x16xf32>
    %cst_36 = arith.constant dense<0.000000e+00> : vector<64x16xf32>
    %22 = tpu.matmul %19, %21, %cst_36 {dimension_numbers = #tpu.dot_dimension_numbers<[1], [0], [0], [1], [0, 0, 1, 1], [], []>} : vector<64x16xf32>, vector<16x16xf32>, vector<64x16xf32> -> vector<64x16xf32>
    %23 = arith.addf %17, %22 : vector<64x16xf32>
    %c0_37 = arith.constant 0 : index
    %c0_38 = arith.constant 0 : index
    %c1_39 = arith.constant 1 : index
    %c0_40 = arith.constant 0 : index
    %24 = vector.load %arg7[%c0_37, %c0_38, %c1_39, %c0_40] : memref<1x10x10x16xf32, #tpu.memory_space<vmem>>, vector<1x8x8x16xf32>
    %25 = vector.shape_cast %24 : vector<1x8x8x16xf32> to vector<64x16xf32>
    %c1_41 = arith.constant 1 : index
    %c0_42 = arith.constant 0 : index
    %c0_43 = arith.constant 0 : index
    %26 = vector.load %arg4[%c1_41, %c0_42, %c0_43] : memref<9x16x16xf32, #tpu.memory_space<vmem>>, vector<1x16x16xf32>
    %27 = vector.shape_cast %26 : vector<1x16x16xf32> to vector<16x16xf32>
    %cst_44 = arith.constant dense<0.000000e+00> : vector<64x16xf32>
    %28 = tpu.matmul %25, %27, %cst_44 {dimension_numbers = #tpu.dot_dimension_numbers<[1], [0], [0], [1], [0, 0, 1, 1], [], []>} : vector<64x16xf32>, vector<16x16xf32>, vector<64x16xf32> -> vector<64x16xf32>
    %29 = arith.addf %23, %28 : vector<64x16xf32>
    %c0_45 = arith.constant 0 : index
    %c0_46 = arith.constant 0 : index
    %c2 = arith.constant 2 : index
    %c0_47 = arith.constant 0 : index
    %30 = vector.load %arg7[%c0_45, %c0_46, %c2, %c0_47] : memref<1x10x10x16xf32, #tpu.memory_space<vmem>>, vector<1x8x8x16xf32>
    %31 = vector.shape_cast %30 : vector<1x8x8x16xf32> to vector<64x16xf32>
    %c2_48 = arith.constant 2 : index
    %c0_49 = arith.constant 0 : index
    %c0_50 = arith.constant 0 : index
    %32 = vector.load %arg4[%c2_48, %c0_49, %c0_50] : memref<9x16x16xf32, #tpu.memory_space<vmem>>, vector<1x16x16xf32>
    %33 = vector.shape_cast %32 : vector<1x16x16xf32> to vector<16x16xf32>
    %cst_51 = arith.constant dense<0.000000e+00> : vector<64x16xf32>
    %34 = tpu.matmul %31, %33, %cst_51 {dimension_numbers = #tpu.dot_dimension_numbers<[1], [0], [0], [1], [0, 0, 1, 1], [], []>} : vector<64x16xf32>, vector<16x16xf32>, vector<64x16xf32> -> vector<64x16xf32>
    %35 = arith.addf %29, %34 : vector<64x16xf32>
    %c0_52 = arith.constant 0 : index
    %c1_53 = arith.constant 1 : index
    %c0_54 = arith.constant 0 : index
    %c0_55 = arith.constant 0 : index
    %36 = vector.load %arg7[%c0_52, %c1_53, %c0_54, %c0_55] : memref<1x10x10x16xf32, #tpu.memory_space<vmem>>, vector<1x8x8x16xf32>
    %37 = vector.shape_cast %36 : vector<1x8x8x16xf32> to vector<64x16xf32>
    %c3 = arith.constant 3 : index
    %c0_56 = arith.constant 0 : index
    %c0_57 = arith.constant 0 : index
    %38 = vector.load %arg4[%c3, %c0_56, %c0_57] : memref<9x16x16xf32, #tpu.memory_space<vmem>>, vector<1x16x16xf32>
    %39 = vector.shape_cast %38 : vector<1x16x16xf32> to vector<16x16xf32>
    %cst_58 = arith.constant dense<0.000000e+00> : vector<64x16xf32>
    %40 = tpu.matmul %37, %39, %cst_58 {dimension_numbers = #tpu.dot_dimension_numbers<[1], [0], [0], [1], [0, 0, 1, 1], [], []>} : vector<64x16xf32>, vector<16x16xf32>, vector<64x16xf32> -> vector<64x16xf32>
    %41 = arith.addf %35, %40 : vector<64x16xf32>
    %c0_59 = arith.constant 0 : index
    %c1_60 = arith.constant 1 : index
    %c1_61 = arith.constant 1 : index
    %c0_62 = arith.constant 0 : index
    %42 = vector.load %arg7[%c0_59, %c1_60, %c1_61, %c0_62] : memref<1x10x10x16xf32, #tpu.memory_space<vmem>>, vector<1x8x8x16xf32>
    %43 = vector.shape_cast %42 : vector<1x8x8x16xf32> to vector<64x16xf32>
    %c4 = arith.constant 4 : index
    %c0_63 = arith.constant 0 : index
    %c0_64 = arith.constant 0 : index
    %44 = vector.load %arg4[%c4, %c0_63, %c0_64] : memref<9x16x16xf32, #tpu.memory_space<vmem>>, vector<1x16x16xf32>
    %45 = vector.shape_cast %44 : vector<1x16x16xf32> to vector<16x16xf32>
    %cst_65 = arith.constant dense<0.000000e+00> : vector<64x16xf32>
    %46 = tpu.matmul %43, %45, %cst_65 {dimension_numbers = #tpu.dot_dimension_numbers<[1], [0], [0], [1], [0, 0, 1, 1], [], []>} : vector<64x16xf32>, vector<16x16xf32>, vector<64x16xf32> -> vector<64x16xf32>
    %47 = arith.addf %41, %46 : vector<64x16xf32>
    %c0_66 = arith.constant 0 : index
    %c1_67 = arith.constant 1 : index
    %c2_68 = arith.constant 2 : index
    %c0_69 = arith.constant 0 : index
    %48 = vector.load %arg7[%c0_66, %c1_67, %c2_68, %c0_69] : memref<1x10x10x16xf32, #tpu.memory_space<vmem>>, vector<1x8x8x16xf32>
    %49 = vector.shape_cast %48 : vector<1x8x8x16xf32> to vector<64x16xf32>
    %c5 = arith.constant 5 : index
    %c0_70 = arith.constant 0 : index
    %c0_71 = arith.constant 0 : index
    %50 = vector.load %arg4[%c5, %c0_70, %c0_71] : memref<9x16x16xf32, #tpu.memory_space<vmem>>, vector<1x16x16xf32>
    %51 = vector.shape_cast %50 : vector<1x16x16xf32> to vector<16x16xf32>
    %cst_72 = arith.constant dense<0.000000e+00> : vector<64x16xf32>
    %52 = tpu.matmul %49, %51, %cst_72 {dimension_numbers = #tpu.dot_dimension_numbers<[1], [0], [0], [1], [0, 0, 1, 1], [], []>} : vector<64x16xf32>, vector<16x16xf32>, vector<64x16xf32> -> vector<64x16xf32>
    %53 = arith.addf %47, %52 : vector<64x16xf32>
    %c0_73 = arith.constant 0 : index
    %c2_74 = arith.constant 2 : index
    %c0_75 = arith.constant 0 : index
    %c0_76 = arith.constant 0 : index
    %54 = vector.load %arg7[%c0_73, %c2_74, %c0_75, %c0_76] : memref<1x10x10x16xf32, #tpu.memory_space<vmem>>, vector<1x8x8x16xf32>
    %55 = vector.shape_cast %54 : vector<1x8x8x16xf32> to vector<64x16xf32>
    %c6 = arith.constant 6 : index
    %c0_77 = arith.constant 0 : index
    %c0_78 = arith.constant 0 : index
    %56 = vector.load %arg4[%c6, %c0_77, %c0_78] : memref<9x16x16xf32, #tpu.memory_space<vmem>>, vector<1x16x16xf32>
    %57 = vector.shape_cast %56 : vector<1x16x16xf32> to vector<16x16xf32>
    %cst_79 = arith.constant dense<0.000000e+00> : vector<64x16xf32>
    %58 = tpu.matmul %55, %57, %cst_79 {dimension_numbers = #tpu.dot_dimension_numbers<[1], [0], [0], [1], [0, 0, 1, 1], [], []>} : vector<64x16xf32>, vector<16x16xf32>, vector<64x16xf32> -> vector<64x16xf32>
    %59 = arith.addf %53, %58 : vector<64x16xf32>
    %c0_80 = arith.constant 0 : index
    %c2_81 = arith.constant 2 : index
    %c1_82 = arith.constant 1 : index
    %c0_83 = arith.constant 0 : index
    %60 = vector.load %arg7[%c0_80, %c2_81, %c1_82, %c0_83] : memref<1x10x10x16xf32, #tpu.memory_space<vmem>>, vector<1x8x8x16xf32>
    %61 = vector.shape_cast %60 : vector<1x8x8x16xf32> to vector<64x16xf32>
    %c7 = arith.constant 7 : index
    %c0_84 = arith.constant 0 : index
    %c0_85 = arith.constant 0 : index
    %62 = vector.load %arg4[%c7, %c0_84, %c0_85] : memref<9x16x16xf32, #tpu.memory_space<vmem>>, vector<1x16x16xf32>
    %63 = vector.shape_cast %62 : vector<1x16x16xf32> to vector<16x16xf32>
    %cst_86 = arith.constant dense<0.000000e+00> : vector<64x16xf32>
    %64 = tpu.matmul %61, %63, %cst_86 {dimension_numbers = #tpu.dot_dimension_numbers<[1], [0], [0], [1], [0, 0, 1, 1], [], []>} : vector<64x16xf32>, vector<16x16xf32>, vector<64x16xf32> -> vector<64x16xf32>
    %65 = arith.addf %59, %64 : vector<64x16xf32>
    %c0_87 = arith.constant 0 : index
    %c2_88 = arith.constant 2 : index
    %c2_89 = arith.constant 2 : index
    %c0_90 = arith.constant 0 : index
    %66 = vector.load %arg7[%c0_87, %c2_88, %c2_89, %c0_90] : memref<1x10x10x16xf32, #tpu.memory_space<vmem>>, vector<1x8x8x16xf32>
    %67 = vector.shape_cast %66 : vector<1x8x8x16xf32> to vector<64x16xf32>
    %c8 = arith.constant 8 : index
    %c0_91 = arith.constant 0 : index
    %c0_92 = arith.constant 0 : index
    %68 = vector.load %arg4[%c8, %c0_91, %c0_92] : memref<9x16x16xf32, #tpu.memory_space<vmem>>, vector<1x16x16xf32>
    %69 = vector.shape_cast %68 : vector<1x16x16xf32> to vector<16x16xf32>
    %cst_93 = arith.constant dense<0.000000e+00> : vector<64x16xf32>
    %70 = tpu.matmul %67, %69, %cst_93 {dimension_numbers = #tpu.dot_dimension_numbers<[1], [0], [0], [1], [0, 0, 1, 1], [], []>} : vector<64x16xf32>, vector<16x16xf32>, vector<64x16xf32> -> vector<64x16xf32>
    %71 = arith.addf %65, %70 : vector<64x16xf32>
    %c0_94 = arith.constant 0 : index
    %c0_95 = arith.constant 0 : index
    %c0_96 = arith.constant 0 : index
    %c0_97 = arith.constant 0 : index
    %72 = vector.load %arg1[%c0_94, %c0_95, %c0_96, %c0_97] : memref<1x8x8x16xf32, #tpu.memory_space<vmem>>, vector<1x8x8x16xf32>
    %73 = vector.shape_cast %72 : vector<1x8x8x16xf32> to vector<64x16xf32>
    %c0_98 = arith.constant 0 : index
    %c0_99 = arith.constant 0 : index
    %74 = vector.load %arg5[%c0_98, %c0_99] : memref<1x16xf32, #tpu.memory_space<vmem>>, vector<1x16xf32>
    %75 = vector.broadcast %74 : vector<1x16xf32> to vector<64x16xf32>
    %76 = arith.addf %71, %75 : vector<64x16xf32>
    %77 = arith.addf %76, %73 : vector<64x16xf32>
    %cst_100 = arith.constant 0.000000e+00 : f32
    %78 = vector.broadcast %cst_100 : f32 to vector<64x16xf32>
    %79 = arith.maximumf %77, %78 : vector<64x16xf32>
    %80 = vector.shape_cast %79 : vector<64x16xf32> to vector<1x8x8x16xf32>
    %c0_101 = arith.constant 0 : index
    %c0_102 = arith.constant 0 : index
    %c0_103 = arith.constant 0 : index
    %c0_104 = arith.constant 0 : index
    %81 = vector.load %arg6[%c0_101, %c0_102, %c0_103, %c0_104] : memref<1x8x8x16xf32, #tpu.memory_space<vmem>>, vector<1x8x8x16xf32>
    tpu.vector_store %arg6[%c0_101, %c0_102, %c0_103, %c0_104], %80 {strides = array<i32>} : memref<1x8x8x16xf32, #tpu.memory_space<vmem>>, vector<1x8x8x16xf32>,
    return
  }
  func.func @transform_0(%arg0: i32) -> (i32, i32, i32, i32) {
    %c0_i32 = arith.constant 0 : i32
    %c0_i32_0 = arith.constant 0 : i32
    %c0_i32_1 = arith.constant 0 : i32
    %c0_i32_2 = arith.constant 0 : i32
    return %arg0, %c0_i32, %c0_i32_0, %c0_i32_1 : i32, i32, i32, i32
  }
  func.func @transform_1(%arg0: i32) -> (i32, i32) {
    %c0_i32 = arith.constant 0 : i32
    %c0_i32_0 = arith.constant 0 : i32
    %c0_i32_1 = arith.constant 0 : i32
    return %c0_i32, %c0_i32_0 : i32, i32
  }
  func.func @transform_2(%arg0: i32) -> (i32, i32) {
    %c0_i32 = arith.constant 0 : i32
    %c0_i32_0 = arith.constant 0 : i32
    %c0_i32_1 = arith.constant 0 : i32
    return %c0_i32, %c0_i32_0 : i32, i32
  }
  func.func @transform_3(%arg0: i32) -> (i32, i32, i32) {
    %c0_i32 = arith.constant 0 : i32
    %c0_i32_0 = arith.constant 0 : i32
    %c0_i32_1 = arith.constant 0 : i32
    %c0_i32_2 = arith.constant 0 : i32
    return %c0_i32, %c0_i32_0, %c0_i32_1 : i32, i32, i32
  }
  func.func @transform_4(%arg0: i32) -> (i32, i32) {
    %c0_i32 = arith.constant 0 : i32
    %c0_i32_0 = arith.constant 0 : i32
    %c0_i32_1 = arith.constant 0 : i32
    return %c0_i32, %c0_i32_0 : i32, i32
  }
  func.func @transform_5(%arg0: i32) -> (i32, i32, i32, i32) {
    %c0_i32 = arith.constant 0 : i32
    %c0_i32_0 = arith.constant 0 : i32
    %c0_i32_1 = arith.constant 0 : i32
    %c0_i32_2 = arith.constant 0 : i32
    return %arg0, %c0_i32, %c0_i32_0, %c0_i32_1 : i32, i32, i32, i32
  }
}

</mosaic_0001>

<bundles_post_ra>
// kernel: tpu_custom_call.1
= control target key start
LH: loop header
LB: loop body
LE: loop exit
PB: predicated region body
PF: predicated region fallthrough
CT: control target
= control target key end

     0   :  { %10 = vsyncpa [#allocation4], 0  ;;  %s3130_s0 = inlined_call_operand.hbm [shape: f32[2,8,8,16], index: 0, kind: input, shape index: {}]   ;;  %s3131_s1 = inlined_call_operand.hbm [shape: f32[16,16], index: 1, kind: input, shape index: {}]   ;;  %s3132_s2 = inlined_call_operand.vmem [shape: f32[1,16], index: 2, kind: input, shape index: {}]   ;;  %s3133_s3 = inlined_call_operand.hbm [shape: f32[9,16,16], index: 3, kind: input, shape index: {}]   ;;  %s3134_s4 = inlined_call_operand.vmem [shape: f32[1,16], index: 4, kind: input, shape index: {}]   ;;  %s3135_s5 = inlined_call_operand.hbm [shape: f32[2,8,8,16], index: 5, kind: output, shape index: {}]  }
   0x1   :  { %12 = vsyncpa [#allocation4 + $0x1], 0 }
   0x2   :  { %13 = vsyncpa [#allocation7], 0 }
   0x3   :  { %14 = vsyncpa [#allocation5], 0 }
   0x4   :  { %16 = vsyncpa [#allocation5 + $0x1], 0  ;;  %s2667_s18 = smov 0   ;;  %s2669_s19 = smov 0  }
   0x5   :  { %s2671_s20 = smov 0   ;;  %s2673_s21 = smov 0  }
   0x6 LB: > { %s2688_s22 = sadd.s32 4294967295, %s2626_s21   ;;  %s1932_s23 = sadd.s32 4294967294, %s2626_s21   ;;  %s2626_s21 = sphi %s2673_s21, %s3155_s21   ;;  %s2622_s20 = sphi %s2671_s20, %s3154_s20   ;;  %s2618_s19 = sphi %s2669_s19, %s3153_s19   ;;  %s2614_s18 = sphi %s2667_s18, %s3152_s18  }
   0x7   : > { %p42_p0 = scmp.ne.s32.totalorder %s2618_s19, %s2614_s18  ;;  %p3136_p1 = scmp.eq.s32.totalorder %s2688_s22, 0 }
   0x8   : > { %p156_p3 = scmp.eq.s32.totalorder %s1932_s23, 1  ;;  %p1933_p5 = scmp.ge.s32.totalorder %s2626_s21, 1 }
   0x9   : > { %p2697_p4 = por %p3136_p1, %p42_p0  ;;  %p163_p7 = scmp.lt.s32.totalorder %s2626_s21, 3 }
   0xa   : > { %p2702_p6 = por %p156_p3, %p42_p0  ;;  %s2628_s27 = smov [#allocation6]  }
   0xb   : > { %s3139_s24 = scalar_select %p2697_p4, 1, 0 }
   0xc   : > { %s3140_s25 = scalar_select %p2702_p6, 1, 0 }
   0xd   : > { %p2707_p8 = pnand %p1933_p5, %p163_p7  ;;  %s175_s28 = sshll.u32 %s2628_s27, 4  ;;  %s2711_s28 = int_to_ptr.vmem [resolvable:$true] %s175_s28 }
   0xe   : > { %s2629_s30 = smov [#allocation8]   ;;  %s2470_s9 = scalar_lea.hbm %s3131_s1, 256 }
   0xf   : > { %p2410_p9 = pneg %p2707_p8  ;;  %s191_s6 = sshll.u32 %s2629_s30, 4  ;;  %s2722_s6 = int_to_ptr.vmem [resolvable:$true] %s191_s6 }
  0x10   : > { %p2471_p12 = scmp.ne.s32.totalorder %s3131_s1, %s2470_s9  ;;  %p2477_p5 = scmp.lt.u32.totalorder %s2470_s9, %s3131_s1 }
  0x11   : > { %p2718_p11 = pnand %p2410_p9, %p3136_p1 }
  0x13   : > { %p2472_p13 = pneg %p2718_p11 }
  0x15   : > { %p2473_p0 = pnand %p2472_p13, %p2471_p12 }
  0x17   : > { %p2474_p3 = pneg %p2473_p0 }
  0x19   : > { %p2479_p7 = pnand %p2477_p5, %p2474_p3 }
  0x1b   : > { %2482 = shalt.err (!%p2479_p7)
}
  0x1c   : > { %s2483_s14 = scalar_lea.vmem %s2711_s28, 256  ;;  %p2491_p2 = scmp.lt.s32.totalorder %s2711_s28, %s2711_s28 }
  0x1d   : > { %p2484_p9 = scmp.ne.s32.totalorder %s2711_s28, %s2483_s14  ;;  %p2492_p12 = scmp.lt.s32.totalorder %s2483_s14, %s2483_s14 }
  0x1f   : > { %p2486_p10 = pnand %p2484_p9, %p2472_p13  ;;  %p2493_p0 = por %p2492_p12, %p2491_p2 }
  0x21   : > { %p2487_p1 = pneg %p2486_p10 }
  0x23   : > { %p2494_p6 = pnand %p2493_p0, %p2487_p1 }
  0x25   : > { %2497 = shalt.err (!%p2494_p6)
}
  0x26   : > { %s2630_s15 = smov 128   ;;  %s2631_s16 = smov 8  }
  0x27   : > { %2413 = dma.hbm_to_vmem [thread:$0]  (!%p2718_p11), %s3131_s1, 256, %s2711_s28, [#allocation7], %s2630_s15, %s2630_s15, %s2631_s16  }
  0x28   : > { %s2498_s7 = scalar_lea.hbm %s3133_s3, 2304 }
  0x29   : > { %p2499_p1 = scmp.ne.s32.totalorder %s3133_s3, %s2498_s7  ;;  %p2505_p10 = scmp.lt.u32.totalorder %s2498_s7, %s3133_s3 }
  0x2b   : > { %p2501_p2 = pnand %p2499_p1, %p2472_p13 }
  0x2d   : > { %p2502_p6 = pneg %p2501_p2 }
  0x2f   : > { %p2507_p3 = pnand %p2505_p10, %p2502_p6 }
  0x31   : > { %2510 = shalt.err (!%p2507_p3)
}
  0x32   : > { %s2511_s28 = scalar_lea.vmem %s2722_s6, 2304  ;;  %p2519_p12 = scmp.lt.s32.totalorder %s2722_s6, %s2722_s6 }
  0x33   : > { %p2512_p5 = scmp.ne.s32.totalorder %s2722_s6, %s2511_s28  ;;  %p2520_p0 = scmp.lt.s32.totalorder %s2511_s28, %s2511_s28 }
  0x35   : > { %p2514_p7 = pnand %p2512_p5, %p2472_p13  ;;  %p2521_p1 = por %p2520_p0, %p2519_p12 }
  0x37   : > { %p2515_p9 = pneg %p2514_p7 }
  0x39   : > { %p2522_p2 = pnand %p2521_p1, %p2515_p9 }
  0x3b   : > { %2525 = shalt.err (!%p2522_p2)
}
  0x3c   : > { %2416 = dma.hbm_to_vmem [thread:$0]  (!%p2718_p11), %s3133_s3, 2304, %s2722_s6, [#allocation7], %s2630_s15, %s2630_s15, %s2631_s16  }
  0x3d   : > { %s2783_s29 = sadd.s32 1, %s2626_s21   ;;  %s29_s14 = sadd.s32 1, %s2622_s20 }
  0x3e   : > { %s26_s17 = ssub.s32 %s2626_s21, %s2783_s29  ;;  %p36_p13 = scmp.ne.s32.totalorder %s2622_s20, %s2618_s19 }
  0x3f   : > { %p27_p6 = scmp.eq.s32.totalorder %s26_s17, 0  ;;  %p37_p10 = scmp.eq.s32.totalorder %s2626_s21, 0 }
  0x40   : > { %p3143_p3 = scmp.eq.s32.totalorder %s2688_s22, 1  ;;  %p2427_p7 = scmp.lt.s32.totalorder %s2626_s21, 2 }
  0x41   : > { %s2799_s27 = scalar_select %p27_p6, %s2622_s20, %s29_s14  }
  0x42   : > { %p2793_p5 = por %p3143_p3, %p36_p13  ;;  %p38_p9 = por %p37_p10, %p36_p13 }
  0x43   : > { %s208_s30 = sand.u32 1, %s2622_s20   ;;  %s2032_s6 = sshll.u32 %s2626_s21, 10 }
  0x44   : > { %s3144_s23 = scalar_select %p2793_p5, 1, 0 }
  0x45   : > { %s1937_s7 = sshll.u32 %s208_s30, 6  ;;  %s2806_s10 = scalar_lea.hbm %s3130_s0, %s2032_s6 }
  0x46   : > { %s212_s11 = scalar_lea.vmem [#allocation3], %s1937_s7  ;;  %p2810_p11 = pnand %p2427_p7, %p38_p9 }
  0x47   : > { %s219_s28 = sshll.u32 %s212_s11, 4  ;;  %s2814_s13 = scalar_lea.sflag [#allocation4], %s208_s30  ;;  %s2808_s28 = int_to_ptr.vmem [resolvable:$true] %s219_s28 }
  0x48   : > { %s2526_s14 = scalar_lea.hbm %s2806_s10, 1024  ;;  %p2528_p0 = pneg %p2810_p11 }
  0x49   : > { %p2527_p12 = scmp.ne.s32.totalorder %s2806_s10, %s2526_s14  ;;  %s2531_s6 = scalar_lea.hbm %s3130_s0, 2048 }
  0x4a   : > { %p2532_p13 = scmp.lt.u32.totalorder %s2806_s10, %s3130_s0  ;;  %p2533_p6 = scmp.lt.u32.totalorder %s2531_s6, %s2526_s14 }
  0x4b   : > { %p2529_p1 = pnand %p2528_p0, %p2527_p12  ;;  %p2535_p3 = scmp.lt.u32.totalorder %s2526_s14, %s2806_s10 }
  0x4c   : > { %p2534_p10 = por %p2533_p6, %p2532_p13 }
  0x4d   : > { %p2530_p2 = pneg %p2529_p1 }
  0x4e   : > { %p2536_p7 = por %p2535_p3, %p2534_p10 }
  0x50   : > { %p2537_p9 = pnand %p2536_p7, %p2530_p2 }
  0x52   : > { %2540 = shalt.err (!%p2537_p9)
}
  0x53   : > { %s2541_s30 = scalar_lea.vmem %s2808_s28, 1024  ;;  %s2632_s11 = smov [#allocation3]  }
  0x54   : > { %p2542_p12 = scmp.ne.s32.totalorder %s2808_s28, %s2541_s30  ;;  %s2546_s17 = sshll.u32 %s2632_s11, 4  ;;  %s2547_s17 = int_to_ptr.vmem [resolvable:$false] %s2546_s17 }
  0x55   : > { %s2548_s7 = scalar_lea.vmem %s2547_s17, 2048  ;;  %p2549_p4 = scmp.lt.s32.totalorder %s2808_s28, %s2547_s17 }
  0x56   : > { %p2544_p1 = pnand %p2542_p12, %p2528_p0  ;;  %p2550_p13 = scmp.lt.s32.totalorder %s2548_s7, %s2541_s30 }
  0x58   : > { %p2545_p5 = pneg %p2544_p1  ;;  %p2551_p6 = por %p2550_p13, %p2549_p4 }
  0x5a   : > { %p2552_p10 = pnand %p2551_p6, %p2545_p5 }
  0x5c   : > { %2555 = shalt.err (!%p2552_p10)
}
  0x5d   : > { %2420 = dma.hbm_to_vmem [thread:$0]  (!%p2810_p11), %s2806_s10, 1024, %s2808_s28, %s2814_s13, %s2630_s15, %s2630_s15, %s2631_s16  }
  0x5e   : > { %231 = sbr.rel (%p2707_p8) target bundleno = 650 (0x28a), region = 40  ;;  %s2848_s14 = sand.u32 (!%p2707_p8), 1, %s2618_s19  }
  0x5f   : > { %s1941_s6 = sshll.u32 (!%p2707_p8), %s2848_s14, 6  ;;  %s234_s8 = scalar_lea.sflag (!%p2707_p8), [#allocation4], %s2848_s14 }
  0x60   : > { %s237_s12 = scalar_lea.vmem (!%p2707_p8), [#allocation3], %s1941_s6  ;;  %p3146_p4 = scmp.ne.s32.totalorder (!%p2707_p8), %s3139_s24, 0 }
  0x65   : > { %2601 = dma.done.wait (%p3146_p4), %s234_s8, 1024  }
  0x66   : > { %2603 = vsyncadd (%p3146_p4), %s234_s8, 4294966272  ;;  %p3147_p5 = scmp.eq.s32.totalorder %s2688_s22, 0 }
  0x68   : > { %2605 = dma.done.wait (%p3147_p5), [#allocation7], 2560   ;;  %p3148_p8 = pmov %p3147_p5 }
  0x69   : > { %vm289_vm0 = vcmask 130048   ;;  %v280_v0 = vld [vmem:[#allocation6] sm:$0xff]  ;;  %v281_v1 = vld [vmem:[#allocation6 + $0x8] sm:$0xff]  ;;  %v2868_v5 = vld [vmem:[%s237_s12 + $0x10] sm:$0xff]  ;;  %vm428_vm1 = vcmask 123904   ;;  %vm433_vm2 = vcmask 122880  }
  0x6a   : > { %2607 = vsyncadd (%p3148_p8), [#allocation7], 4294964736  ;;  %v2862_v2 = vld [vmem:[%s237_s12] sm:$0xff]  ;;  %v2294_v3 = vpack.c.bf16 %v281_v1, %v280_v0  ;;  %v2866_v4 = vld [vmem:[%s237_s12 + $0x8] sm:$0xff]  ;;  %v2633_v11 = vmov 0.0   ;;  %s3055_s10 = scalar_lea.vmem [#allocation9], %s1941_s6 }
  0x6b   : > { %2138 = vmatprep.mubr.msk.f32.mxu0 %vm289_vm0, %v2862_v2  ;;  %v2874_v6 = vld [vmem:[%s237_s12 + $0x18] sm:$0xff]  ;;  %v2876_v7 = vld [vmem:[%s237_s12 + $0x20] sm:$0xff]  ;;  %v2882_v8 = vld [vmem:[%s237_s12 + $0x28] sm:$0xff]  ;;  %427 = vst.msk [vmem:[#allocation2] sm:$0xff] %vm289_vm0, %v2633_v11  ;;  %s2033_s28 = sshll.u32 %s2688_s22, 10  ;;  %s1840_s13 = sshll.u32 %s3055_s10, 4  ;;  %s3082_s13 = int_to_ptr.vmem [resolvable:$true] %s1840_s13 }
  0x6c   : > { %2295 = vmatprep.subr.bf16.mxu0 %v2294_v3  ;;  %v2884_v9 = vld [vmem:[%s237_s12 + $0x30] sm:$0xff]  ;;  %v2890_v10 = vld [vmem:[%s237_s12 + $0x38] sm:$0xff]  ;;  %429 = vst.msk [vmem:[#allocation2 + $0x8] sm:$0x3] %vm428_vm1, %v2633_v11  ;;  %432 = vst.msk [vmem:[#allocation2 + $0x98] sm:$0x3] %vm428_vm1, %v2633_v11  ;;  %s3080_s11 = scalar_lea.hbm %s3135_s5, %s2033_s28 }
  0x6d   : > { %2297 = vmatpush3.bf16.msra.mxu0 %v2294_v3  ;;  %431 = vst.msk [vmem:[#allocation2 + $0x90] sm:$0xff] %vm289_vm0, %v2633_v11  ;;  %v482_v12 = vld [vmem:[#allocation8 + $0x10] sm:$0xff]  ;;  %v483_v13 = vld [vmem:[#allocation8 + $0x18] sm:$0xff]  ;;  %v1047_v15 = vld [vmem:[#allocation8 + $0x40] sm:$0xff]  ;;  %s1827_s22 = scalar_lea.sflag [#allocation5], %s2848_s14  ;;  %s2556_s17 = scalar_lea.vmem %s3082_s13, 1024 }
  0x6e   : > { %445 = vst.msk [vmem:[#allocation2 + $0x19] sm:$0x1] %vm433_vm2, %v2633_v11  ;;  %435 = vst.msk [vmem:[#allocation2 + $0x10] sm:$0x1] %vm433_vm2, %v2633_v11  ;;  %v2298_v14 = vpack.c.bf16 %v483_v13, %v482_v12  ;;  %v1048_v16 = vld [vmem:[#allocation8 + $0x48] sm:$0xff]  ;;  %v1195_v19 = vld [vmem:[#allocation8 + $0x50] sm:$0xff]  ;;  %p2557_p11 = scmp.ne.s32.totalorder %s3082_s13, %s2556_s17 }
  0x6f   : > { %436 = vst.msk [vmem:[#allocation2 + $0x20] sm:$0x1] %vm433_vm2, %v2633_v11  ;;  %437 = vst.msk [vmem:[#allocation2 + $0x30] sm:$0x1] %vm433_vm2, %v2633_v11  ;;  %v2314_v17 = vpack.c.bf16 %v1048_v16, %v1047_v15  ;;  %v1196_v20 = vld [vmem:[#allocation8 + $0x58] sm:$0xff]  ;;  %v471_v22 = vld [vmem:[#allocation8] sm:$0xff] }
  0x70   : > { %2139 = vmatmul.mubr.msk.f32.vlgmr.msra.gmra.mrb[0].mxu0 %vm289_vm0, %v2866_v4  ;;  %438 = vst.msk [vmem:[#allocation2 + $0x40] sm:$0x1] %vm433_vm2, %v2633_v11  ;;  %439 = vst.msk [vmem:[#allocation2 + $0x50] sm:$0x1] %vm433_vm2, %v2633_v11  ;;  %2299 = vmatprep.subr.bf16.mxu0 %v2298_v14  ;;  %v2318_v21 = vpack.c.bf16 %v1196_v20, %v1195_v19  ;;  %v472_v23 = vld [vmem:[#allocation8 + $0x8] sm:$0xff]  ;;  %v1344_v41 = vld [vmem:[#allocation8 + $0x60] sm:$0xff] }
  0x71   : > { %2141 = vmatprep.mubr.msk.f32.mxu0 %vm289_vm0, %v2868_v5  ;;  %440 = vst.msk [vmem:[#allocation2 + $0x60] sm:$0x1] %vm433_vm2, %v2633_v11  ;;  %441 = vst.msk [vmem:[#allocation2 + $0x70] sm:$0x1] %vm433_vm2, %v2633_v11  ;;  %2315 = vmatprep.subr.bf16.mxu1 %v2314_v17  ;;  %v2302_v24 = vpack.c.bf16 %v472_v23, %v471_v22  ;;  %v1945_v25 = vld [vmem:[%s3132_s2] ss:$0 sm:$0xff] }
  0x72   : > { %442 = vst.msk [vmem:[#allocation2 + $0x80] sm:$0x1] %vm433_vm2, %v2633_v11  ;;  %446 = vst.msk [vmem:[#allocation2 + $0x29] sm:$0x1] %vm433_vm2, %v2633_v11  ;;  %2301 = vmatpush3.bf16.msra.mxu0 %v2298_v14  ;;  %2317 = vmatpush3.bf16.msra.mxu1 %v2314_v17  ;;  %v1345_v43 = vld [vmem:[#allocation8 + $0x68] sm:$0xff]  ;;  %v751_v44 = vld [vmem:[#allocation8 + $0x20] sm:$0xff] }
  0x73   : > { %447 = vst.msk [vmem:[#allocation2 + $0x39] sm:$0x1] %vm433_vm2, %v2633_v11  ;;  %448 = vst.msk [vmem:[#allocation2 + $0x49] sm:$0x1] %vm433_vm2, %v2633_v11  ;;  %v473_v18 = vld [vmem:[#allocation2 + $0x1] sm:$0xff]  ;;  %2319 = vmatprep.subr.bf16.mxu1 %v2318_v21  ;;  %2303 = vmatprep.subr.bf16.mxu0 %v2302_v24  ;;  %v752_v45 = vld [vmem:[#allocation8 + $0x28] sm:$0xff]  ;;  %v2322_v52 = vpack.c.bf16 %v1345_v43, %v1344_v41 }
  0x74   : > { %2142 = vmatmul.mubr.msk.f32.gmra.mrb[2].mxu0 %vm289_vm0, %v2874_v6  ;;  %449 = vst.msk [vmem:[#allocation2 + $0x59] sm:$0x1] %vm433_vm2, %v2633_v11  ;;  %450 = vst.msk [vmem:[#allocation2 + $0x69] sm:$0x1] %vm433_vm2, %v2633_v11  ;;  %v2306_v53 = vpack.c.bf16 %v752_v45, %v751_v44  ;;  %v1492_v1 = vld [vmem:[#allocation8 + $0x70] sm:$0xff]  ;;  %v1493_v3 = vld [vmem:[#allocation8 + $0x78] sm:$0xff] }
  0x75   : > { %2144 = vmatprep.mubr.msk.f32.mxu0 %vm289_vm0, %v2876_v7  ;;  %451 = vst.msk [vmem:[#allocation2 + $0x79] sm:$0x1] %vm433_vm2, %v2633_v11  ;;  %452 = vst.msk [vmem:[#allocation2 + $0x89] sm:$0x1] %vm433_vm2, %v2633_v11  ;;  %v899_v12 = vld [vmem:[#allocation8 + $0x30] sm:$0xff]  ;;  %v900_v13 = vld [vmem:[#allocation8 + $0x38] sm:$0xff]  ;;  %v2326_v15 = vpack.c.bf16 %v1493_v3, %v1492_v1 }
  0x76   : > { %434 = vst.msk [vmem:[#allocation2] sm:$0x1] %vm433_vm2, %v2633_v11  ;;  %443 = vst.msk [vmem:[#allocation2 + $0x90] sm:$0x1] %vm433_vm2, %v2633_v11  ;;  %p3149_p0 = scmp.ne.s32.totalorder %s3144_s23, 0  ;;  %s2634_s7 = smov [#allocation9]  }
  0x77   : > { %444 = vst.msk [vmem:[#allocation2 + $0x9] sm:$0x1] %vm433_vm2, %v2633_v11  ;;  %453 = vst.msk [vmem:[#allocation2 + $0x99] sm:$0x1] %vm433_vm2, %v2633_v11  ;;  %s2560_s6 = sshll.u32 %s2634_s7, 4  ;;  %s2561_s6 = int_to_ptr.vmem [resolvable:$false] %s2560_s6 }
  0x78   : > { %2145 = vmatmul.mubr.msk.f32.gmra.mrb[4].mxu0 %vm289_vm0, %v2882_v8  ;;  %p2558_p2 = pnand %p2557_p11, %p3149_p0  ;;  %s2562_s8 = scalar_lea.vmem %s2561_s6, 2048 }
  0x79   : > { %2147 = vmatprep.mubr.msk.f32.mxu0 %vm289_vm0, %v2884_v9  ;;  %p2563_p7 = scmp.lt.s32.totalorder %s3082_s13, %s2561_s6  ;;  %p2564_p9 = scmp.lt.s32.totalorder %s2562_s8, %s2556_s17 }
  0x7a   : > { %p2559_p3 = pneg %p2558_p2 }
  0x7b   : > { %p2565_p12 = por %p2564_p9, %p2563_p7 }
  0x7c   : > { %2148 = vmatmul.mubr.msk.f32.gmra.mrb[6].mxu0 %vm289_vm0, %v2890_v10 }
  0x7d   : > { %2154 = vmatprep.mubr.msk.f32.mxu0 %vm289_vm0, %v473_v18  ;;  %v463_v62 = vld [vmem:[#allocation2] sm:$0xff]  ;;  %v2310_v18 = vpack.c.bf16 %v900_v13, %v899_v12  ;;  %p2566_p1 = pnand %p2565_p12, %p2559_p3 }
 0x143   : > { %v2140_v26 = vpop.f32.mrb[0].mxu0 }
 0x144   : > { %v386_v27 = vadd.f32 %v2140_v26, %v1945_v25  ;;  %v380_v28 = vpop.f32.mrb[1].mxu0 }
 0x145   : > { %v381_v29 = vadd.f32 %v1945_v25, %v380_v28  ;;  %v742_v28 = vld [vmem:[#allocation2 + $0x2] sm:$0xff] }
 0x146   : > { %v420_v30 = vmax.f32 %v386_v27, 0.0 }
 0x147   : > { %v419_v31 = vmax.f32 %v381_v29, 0.0  ;;  %v2143_v32 = vpop.f32.mrb[2].mxu0 }
 0x148   : > { %456 = vst.msk [vmem:[#allocation2 + $0x21] sm:$0xff] %vm289_vm0, %v420_v30  ;;  %v396_v33 = vadd.f32 %v2143_v32, %v1945_v25  ;;  %v390_v34 = vpop.f32.mrb[3].mxu0  ;;  %v1641_v32 = vld [vmem:[#allocation8 + $0x88] sm:$0xff] }
 0x149   : > { %455 = vst.msk [vmem:[#allocation2 + $0x11] sm:$0xff] %vm289_vm0, %v419_v31  ;;  %v391_v35 = vadd.f32 %v1945_v25, %v390_v34  ;;  %v1640_v31 = vld [vmem:[#allocation8 + $0x80] sm:$0xff] }
 0x14a   : > { %v422_v36 = vmax.f32 %v396_v33, 0.0  ;;  %v2330_v33 = vpack.c.bf16 %v1641_v32, %v1640_v31 }
 0x14b   : > { %v421_v37 = vmax.f32 %v391_v35, 0.0  ;;  %v2146_v38 = vpop.f32.mrb[4].mxu0  ;;  %v1342_v35 = vld [vmem:[#allocation2 + $0x90] sm:$0xff] }
 0x14c   : > { %458 = vst.msk [vmem:[#allocation2 + $0x41] sm:$0xff] %vm289_vm0, %v422_v36  ;;  %v406_v39 = vadd.f32 %v2146_v38, %v1945_v25  ;;  %v400_v40 = vpop.f32.mrb[5].mxu0  ;;  %v1490_v36 = vld [vmem:[#allocation2 + $0x91] sm:$0xff] }
 0x14d   : > { %457 = vst.msk [vmem:[#allocation2 + $0x31] sm:$0xff] %vm289_vm0, %v421_v37  ;;  %v401_v42 = vadd.f32 %v1945_v25, %v400_v40  ;;  %v1638_v37 = vld [vmem:[#allocation2 + $0x92] sm:$0xff] }
 0x14e   : > { %v424_v46 = vmax.f32 %v406_v39, 0.0 }
 0x14f   : > { %v423_v47 = vmax.f32 %v401_v42, 0.0  ;;  %v2149_v48 = vpop.f32.mrb[6].mxu0  ;;  %v2928_v55 = vld [vmem:[#allocation2 + $0x21] sm:$0xff] }
 0x150   : > { %460 = vst.msk [vmem:[#allocation2 + $0x61] sm:$0xff] %vm289_vm0, %v424_v46  ;;  %v416_v49 = vadd.f32 %v2149_v48, %v1945_v25  ;;  %v410_v50 = vpop.f32.mrb[7].mxu0  ;;  %v474_v51 = vld [vmem:[#allocation2 + $0x11] sm:$0xff]  ;;  %v465_v16 = vld [vmem:[#allocation2 + $0x20] sm:$0xff] }
 0x151   : > { %459 = vst.msk [vmem:[#allocation2 + $0x51] sm:$0xff] %vm289_vm0, %v423_v47  ;;  %v411_v54 = vadd.f32 %v1945_v25, %v410_v50  ;;  %2155 = vmatmul.mubr.msk.f32.vlgmr.msra.gmra.mrb[8].mxu0 %vm289_vm0, %v474_v51  ;;  %2218 = vmatprep.mubr.msk.f32.mxu1 %vm289_vm0, %v474_v51  ;;  %v1186_v11 = vld [vmem:[#allocation2 + $0x12] sm:$0xff]  ;;  %v2973_v17 = vld [vmem:[#allocation2 + $0x22] sm:$0xff]  ;;  %v2026_v47 = vld [vmem:[%s3134_s4] ss:$0 sm:$0xff] }
 0x152   : > { %v426_v56 = vmax.f32 %v416_v49, 0.0  ;;  %2157 = vmatprep.mubr.msk.f32.mxu0 %vm289_vm0, %v2928_v55  ;;  %2219 = vmatmul.mubr.msk.f32.vlgmr.msra.gmra.mrb[0].mxu1 %vm289_vm0, %v2928_v55  ;;  %v464_v14 = vld [vmem:[#allocation2 + $0x10] sm:$0xff] }
 0x153   : > { %v425_v57 = vmax.f32 %v411_v54, 0.0  ;;  %2321 = vmatpush3.bf16.msra.mxu1 %v2318_v21  ;;  %2305 = vmatpush3.bf16.msra.mxu0 %v2302_v24  ;;  %v2942_v59 = vld [vmem:[#allocation2 + $0x41] sm:$0xff] }
 0x154   : > { %462 = vst.msk [vmem:[#allocation2 + $0x81] sm:$0xff] %vm289_vm0, %v426_v56  ;;  %v2935_v58 = vld [vmem:[#allocation2 + $0x31] sm:$0xff]  ;;  %2323 = vmatprep.subr.bf16.mxu1 %v2322_v52  ;;  %2307 = vmatprep.subr.bf16.mxu0 %v2306_v53  ;;  %v467_v21 = vld [vmem:[#allocation2 + $0x40] sm:$0xff] }
 0x155   : > { %461 = vst.msk [vmem:[#allocation2 + $0x71] sm:$0xff] %vm289_vm0, %v425_v57  ;;  %2158 = vmatmul.mubr.msk.f32.gmra.mrb[10].mxu0 %vm289_vm0, %v2935_v58  ;;  %2221 = vmatprep.mubr.msk.f32.mxu1 %vm289_vm0, %v2935_v58  ;;  %v2978_v19 = vld [vmem:[#allocation2 + $0x32] sm:$0xff]  ;;  %v2983_v22 = vld [vmem:[#allocation2 + $0x42] sm:$0xff] }
 0x156   : > { %2160 = vmatprep.mubr.msk.f32.mxu0 %vm289_vm0, %v2942_v59  ;;  %2222 = vmatmul.mubr.msk.f32.gmra.mrb[2].mxu1 %vm289_vm0, %v2942_v59  ;;  %v466_v20 = vld [vmem:[#allocation2 + $0x30] sm:$0xff] }
 0x157   : > { %v2954_v61 = vld [vmem:[#allocation2 + $0x61] sm:$0xff] }
 0x158   : > { %v2948_v60 = vld [vmem:[#allocation2 + $0x51] sm:$0xff]  ;;  %v469_v25 = vld [vmem:[#allocation2 + $0x60] sm:$0xff] }
 0x159   : > { %2161 = vmatmul.mubr.msk.f32.gmra.mrb[12].mxu0 %vm289_vm0, %v2948_v60  ;;  %2224 = vmatprep.mubr.msk.f32.mxu1 %vm289_vm0, %v2948_v60  ;;  %v1190_v23 = vld [vmem:[#allocation2 + $0x52] sm:$0xff]  ;;  %v1191_v26 = vld [vmem:[#allocation2 + $0x62] sm:$0xff] }
 0x15a   : > { %2163 = vmatprep.mubr.msk.f32.mxu0 %vm289_vm0, %v2954_v61  ;;  %2225 = vmatmul.mubr.msk.f32.gmra.mrb[4].mxu1 %vm289_vm0, %v2954_v61  ;;  %v468_v24 = vld [vmem:[#allocation2 + $0x50] sm:$0xff] }
 0x15b   : > { %v2966_v0 = vld [vmem:[#allocation2 + $0x81] sm:$0xff] }
 0x15c   : > { %v2960_v63 = vld [vmem:[#allocation2 + $0x71] sm:$0xff]  ;;  %v1193_v30 = vld [vmem:[#allocation2 + $0x82] sm:$0xff] }
 0x15d   : > { %2164 = vmatmul.mubr.msk.f32.gmra.mrb[14].mxu0 %vm289_vm0, %v2960_v63  ;;  %2227 = vmatprep.mubr.msk.f32.mxu1 %vm289_vm0, %v2960_v63  ;;  %v1192_v27 = vld [vmem:[#allocation2 + $0x72] sm:$0xff]  ;;  %v1341_v34 = vld [vmem:[#allocation2 + $0x80] sm:$0xff] }
 0x15e   : > { %2228 = vmatmul.mubr.msk.f32.gmra.mrb[6].mxu1 %vm289_vm0, %v2966_v0  ;;  %2170 = vmatprep.mubr.msk.f32.mxu0 %vm289_vm0, %v463_v62  ;;  %v470_v29 = vld [vmem:[#allocation2 + $0x70] sm:$0xff] }
 0x15f   : > { %2234 = vmatprep.mubr.msk.f32.mxu1 %vm289_vm0, %v1186_v11 }
 0x161   : > { %2171 = vmatmul.mubr.msk.f32.vlgmr.msra.gmra.mrb[8].mxu0 %vm289_vm0, %v464_v14 }
 0x162   : > { %2173 = vmatprep.mubr.msk.f32.mxu0 %vm289_vm0, %v465_v16  ;;  %2235 = vmatmul.mubr.msk.f32.vlgmr.msra.gmra.mrb[0].mxu1 %vm289_vm0, %v2973_v17 }
 0x163   : > { %2325 = vmatpush3.bf16.msra.mxu1 %v2322_v52  ;;  %2237 = vmatprep.mubr.msk.f32.mxu1 %vm289_vm0, %v2978_v19 }
 0x164   : > { %2309 = vmatpush3.bf16.msra.mxu0 %v2306_v53  ;;  %2327 = vmatprep.subr.bf16.mxu1 %v2326_v15 }
 0x165   : > { %2174 = vmatmul.mubr.msk.f32.gmra.mrb[10].mxu0 %vm289_vm0, %v466_v20  ;;  %2311 = vmatprep.subr.bf16.mxu0 %v2310_v18 }
 0x166   : > { %2176 = vmatprep.mubr.msk.f32.mxu0 %vm289_vm0, %v467_v21  ;;  %2238 = vmatmul.mubr.msk.f32.gmra.mrb[2].mxu1 %vm289_vm0, %v2983_v22 }
 0x167   : > { %2240 = vmatprep.mubr.msk.f32.mxu1 %vm289_vm0, %v1190_v23 }
 0x169   : > { %2177 = vmatmul.mubr.msk.f32.gmra.mrb[12].mxu0 %vm289_vm0, %v468_v24 }
 0x16a   : > { %2179 = vmatprep.mubr.msk.f32.mxu0 %vm289_vm0, %v469_v25  ;;  %2241 = vmatmul.mubr.msk.f32.gmra.mrb[4].mxu1 %vm289_vm0, %v1191_v26 }
 0x16b   : > { %2243 = vmatprep.mubr.msk.f32.mxu1 %vm289_vm0, %v1192_v27 }
 0x16d   : > { %2180 = vmatmul.mubr.msk.f32.gmra.mrb[14].mxu0 %vm289_vm0, %v470_v29 }
 0x16e   : > { %2244 = vmatmul.mubr.msk.f32.gmra.mrb[6].mxu1 %vm289_vm0, %v1193_v30  ;;  %2186 = vmatprep.mubr.msk.f32.mxu0 %vm289_vm0, %v742_v28 }
 0x16f   : > { %2250 = vmatprep.mubr.msk.f32.mxu1 %vm289_vm0, %v465_v16 }
 0x171   : > { %2187 = vmatmul.mubr.msk.f32.vlgmr.msra.gmra.mrb[8].mxu0 %vm289_vm0, %v1186_v11 }
 0x172   : > { %2189 = vmatprep.mubr.msk.f32.mxu0 %vm289_vm0, %v2973_v17  ;;  %2251 = vmatmul.mubr.msk.f32.vlgmr.msra.gmra.mrb[0].mxu1 %vm289_vm0, %v466_v20 }
 0x173   : > { %2329 = vmatpush3.bf16.msra.mxu1 %v2326_v15  ;;  %2253 = vmatprep.mubr.msk.f32.mxu1 %vm289_vm0, %v467_v21 }
 0x174   : > { %2313 = vmatpush3.bf16.msra.mxu0 %v2310_v18  ;;  %2331 = vmatprep.subr.bf16.mxu1 %v2330_v33 }
 0x175   : > { %2190 = vmatmul.mubr.msk.f32.gmra.mrb[10].mxu0 %vm289_vm0, %v2978_v19 }
 0x176   : > { %2192 = vmatprep.mubr.msk.f32.mxu0 %vm289_vm0, %v2983_v22  ;;  %2254 = vmatmul.mubr.msk.f32.gmra.mrb[2].mxu1 %vm289_vm0, %v468_v24 }
 0x177   : > { %2256 = vmatprep.mubr.msk.f32.mxu1 %vm289_vm0, %v469_v25 }
 0x179   : > { %2193 = vmatmul.mubr.msk.f32.gmra.mrb[12].mxu0 %vm289_vm0, %v1190_v23 }
 0x17a   : > { %2195 = vmatprep.mubr.msk.f32.mxu0 %vm289_vm0, %v1191_v26  ;;  %2257 = vmatmul.mubr.msk.f32.gmra.mrb[4].mxu1 %vm289_vm0, %v470_v29 }
 0x17b   : > { %2259 = vmatprep.mubr.msk.f32.mxu1 %vm289_vm0, %v1341_v34 }
 0x17d   : > { %2196 = vmatmul.mubr.msk.f32.gmra.mrb[14].mxu0 %vm289_vm0, %v1192_v27 }
 0x17e   : > { %2202 = vmatprep.mubr.msk.f32.mxu0 %vm289_vm0, %v464_v14  ;;  %2260 = vmatmul.mubr.msk.f32.gmra.mrb[6].mxu1 %vm289_vm0, %v1342_v35 }
 0x17f   : > { %2266 = vmatprep.mubr.msk.f32.mxu1 %vm289_vm0, %v2928_v55 }
 0x181   : > { %2203 = vmatmul.mubr.msk.f32.vlgmr.msra.gmra.mrb[8].mxu0 %vm289_vm0, %v465_v16 }
 0x182   : > { %2205 = vmatprep.mubr.msk.f32.mxu0 %vm289_vm0, %v466_v20  ;;  %2267 = vmatmul.mubr.msk.f32.vlgmr.msra.gmra.mrb[0].mxu1 %vm289_vm0, %v2935_v58 }
 0x183   : > { %2333 = vmatpush3.bf16.msra.mxu1 %v2330_v33  ;;  %2269 = vmatprep.mubr.msk.f32.mxu1 %vm289_vm0, %v2942_v59 }
 0x185   : > { %2206 = vmatmul.mubr.msk.f32.gmra.mrb[10].mxu0 %vm289_vm0, %v467_v21 }
 0x186   : > { %2208 = vmatprep.mubr.msk.f32.mxu0 %vm289_vm0, %v468_v24  ;;  %2270 = vmatmul.mubr.msk.f32.gmra.mrb[2].mxu1 %vm289_vm0, %v2948_v60 }
 0x187   : > { %2272 = vmatprep.mubr.msk.f32.mxu1 %vm289_vm0, %v2954_v61 }
 0x189   : > { %2209 = vmatmul.mubr.msk.f32.gmra.mrb[12].mxu0 %vm289_vm0, %v469_v25 }
 0x18a   : > { %2211 = vmatprep.mubr.msk.f32.mxu0 %vm289_vm0, %v470_v29  ;;  %2273 = vmatmul.mubr.msk.f32.gmra.mrb[4].mxu1 %vm289_vm0, %v2960_v63 }
 0x18b   : > { %2275 = vmatprep.mubr.msk.f32.mxu1 %vm289_vm0, %v2966_v0 }
 0x18d   : > { %2212 = vmatmul.mubr.msk.f32.gmra.mrb[14].mxu0 %vm289_vm0, %v1341_v34 }
 0x18e   : > { %2276 = vmatmul.mubr.msk.f32.gmra.mrb[6].mxu1 %vm289_vm0, %v1490_v36 }
 0x18f   : > { %2282 = vmatprep.mubr.msk.f32.mxu1 %vm289_vm0, %v2973_v17 }
 0x192   : > { %2283 = vmatmul.mubr.msk.f32.vlgmr.msra.gmra.mrb[0].mxu1 %vm289_vm0, %v2978_v19 }
 0x193   : > { %2285 = vmatprep.mubr.msk.f32.mxu1 %vm289_vm0, %v2983_v22 }
 0x196   : > { %2286 = vmatmul.mubr.msk.f32.gmra.mrb[2].mxu1 %vm289_vm0, %v1190_v23 }
 0x197   : > { %2288 = vmatprep.mubr.msk.f32.mxu1 %vm289_vm0, %v1191_v26 }
 0x19a   : > { %2289 = vmatmul.mubr.msk.f32.gmra.mrb[4].mxu1 %vm289_vm0, %v1192_v27 }
 0x19b   : > { %2291 = vmatprep.mubr.msk.f32.mxu1 %vm289_vm0, %v1193_v30 }
 0x19e   : > { %2292 = vmatmul.mubr.msk.f32.gmra.mrb[6].mxu1 %vm289_vm0, %v1638_v37 }
 0x254   : > { %v2204_v38 = vpop.f32.mrb[8].mxu0 }
 0x255   : > { %v991_v39 = vpop.f32.mrb[9].mxu0 }
 0x258   : > { %v2207_v40 = vpop.f32.mrb[10].mxu0 }
 0x259   : > { %v1001_v41 = vpop.f32.mrb[11].mxu0 }
 0x25c   : > { %v2210_v42 = vpop.f32.mrb[12].mxu0 }
 0x25d   : > { %v1011_v43 = vpop.f32.mrb[13].mxu0 }
 0x260   : > { %v2213_v44 = vpop.f32.mrb[14].mxu0 }
 0x261   : > { %v1021_v45 = vpop.f32.mrb[15].mxu0 }
 0x265   : > { %v2284_v46 = vpop.f32.mrb[0].mxu1 }
 0x266   : > { %v2334_v48 = vadd.f32 %v2284_v46, %v2204_v38  ;;  %v1732_v49 = vpop.f32.mrb[1].mxu1 }
 0x267   : > { %v2335_v50 = vadd.f32 %v1732_v49, %v991_v39 }
 0x268   : > { %v1795_v51 = vadd.f32 %v2334_v48, %v2026_v47 }
 0x269   : > { %v1794_v52 = vadd.f32 %v2335_v50, %v2026_v47  ;;  %v2287_v53 = vpop.f32.mrb[2].mxu1 }
 0x26a   : > { %v1803_v54 = vadd.f32 %v1795_v51, %v2866_v4  ;;  %v2336_v55 = vadd.f32 %v2287_v53, %v2207_v40  ;;  %v1742_v56 = vpop.f32.mrb[3].mxu1 }
 0x26b   : > { %v1802_v57 = vadd.f32 %v1794_v52, %v2862_v2  ;;  %v2337_v58 = vadd.f32 %v1742_v56, %v1001_v41 }
 0x26c   : > { %v1811_v59 = vmax.f32 %v1803_v54, 0.0  ;;  %v1797_v60 = vadd.f32 %v2336_v55, %v2026_v47 }
 0x26d   : > { %v1810_v61 = vmax.f32 %v1802_v57, 0.0  ;;  %v1796_v62 = vadd.f32 %v2337_v58, %v2026_v47  ;;  %v2290_v63 = vpop.f32.mrb[4].mxu1 }
 0x26e   : > { %1819 = vst.msk [vmem:[%s3055_s10 + $0x8] sm:$0xff] %vm289_vm0, %v1811_v59  ;;  %v1805_v4 = vadd.f32 %v1797_v60, %v2874_v6  ;;  %v2338_v0 = vadd.f32 %v2290_v63, %v2210_v42  ;;  %v1752_v1 = vpop.f32.mrb[5].mxu1 }
 0x26f   : > { %1818 = vst.msk [vmem:[%s3055_s10] sm:$0xff] %vm289_vm0, %v1810_v61  ;;  %v1804_v2 = vadd.f32 %v1796_v62, %v2868_v5  ;;  %v2339_v3 = vadd.f32 %v1752_v1, %v1011_v43 }
 0x270   : > { %v1813_v11 = vmax.f32 %v1805_v4, 0.0  ;;  %v1799_v12 = vadd.f32 %v2338_v0, %v2026_v47 }
 0x271   : > { %v1812_v13 = vmax.f32 %v1804_v2, 0.0  ;;  %v1798_v14 = vadd.f32 %v2339_v3, %v2026_v47  ;;  %v2293_v15 = vpop.f32.mrb[6].mxu1 }
 0x272   : > { %1821 = vst.msk [vmem:[%s3055_s10 + $0x18] sm:$0xff] %vm289_vm0, %v1813_v11  ;;  %v1807_v6 = vadd.f32 %v1799_v12, %v2882_v8  ;;  %v2340_v16 = vadd.f32 %v2293_v15, %v2213_v44  ;;  %v1762_v17 = vpop.f32.mrb[7].mxu1 }
 0x273   : > { %1820 = vst.msk [vmem:[%s3055_s10 + $0x10] sm:$0xff] %vm289_vm0, %v1812_v13  ;;  %v1806_v5 = vadd.f32 %v1798_v14, %v2876_v7  ;;  %v2341_v18 = vadd.f32 %v1762_v17, %v1021_v45 }
 0x274   : > { %v1815_v19 = vmax.f32 %v1807_v6, 0.0  ;;  %v1801_v20 = vadd.f32 %v2340_v16, %v2026_v47 }
 0x275   : > { %v1814_v21 = vmax.f32 %v1806_v5, 0.0  ;;  %v1800_v22 = vadd.f32 %v2341_v18, %v2026_v47 }
 0x276   : > { %1823 = vst.msk [vmem:[%s3055_s10 + $0x28] sm:$0xff] %vm289_vm0, %v1815_v19  ;;  %v1809_v8 = vadd.f32 %v1801_v20, %v2890_v10 }
 0x277   : > { %1822 = vst.msk [vmem:[%s3055_s10 + $0x20] sm:$0xff] %vm289_vm0, %v1814_v21  ;;  %v1808_v23 = vadd.f32 %v1800_v22, %v2884_v9 }
 0x278   : > { %v1817_v7 = vmax.f32 %v1809_v8, 0.0 }
 0x279   : > { %v1816_v24 = vmax.f32 %v1808_v23, 0.0 }
 0x27a   : > { %1825 = vst.msk [vmem:[%s3055_s10 + $0x38] sm:$0xff] %vm289_vm0, %v1817_v7 }
 0x27b   : > { %1824 = vst.msk [vmem:[%s3055_s10 + $0x30] sm:$0xff] %vm289_vm0, %v1816_v24 }
 0x27c   : > { %2569 = shalt.err (!%p2566_p1)
}
 0x27d   : > { %s2570_s12 = scalar_lea.hbm %s3080_s11, 1024  ;;  %s2574_s15 = scalar_lea.hbm %s3135_s5, 2048 }
 0x27e   : > { %p2571_p13 = scmp.ne.s32.totalorder %s3080_s11, %s2570_s12  ;;  %p2575_p4 = scmp.lt.u32.totalorder %s3080_s11, %s3135_s5 }
 0x27f   : > { %p2576_p5 = scmp.lt.u32.totalorder %s2574_s15, %s2570_s12  ;;  %p2578_p11 = scmp.lt.u32.totalorder %s2570_s12, %s3080_s11 }
 0x280   : > { %p2572_p6 = pnand %p2571_p13, %p3149_p0 }
 0x281   : > { %p2577_p8 = por %p2576_p5, %p2575_p4 }
 0x282   : > { %p2573_p10 = pneg %p2572_p6 }
 0x283   : > { %p2579_p2 = por %p2578_p11, %p2577_p8 }
 0x285   : > { %p2580_p3 = pnand %p2579_p2, %p2573_p10 }
 0x287   : > { %2583 = shalt.err (!%p2580_p3)
}
 0x288   : > { %s2635_s28 = smov 128   ;;  %s2636_s9 = smov 8  }
 0x289   : > { %2408 = dma.vmem_to_hbm [thread:$0]  (%p3149_p0), %s3082_s13, 1024, %s3080_s11, %s1827_s22, %s2635_s28, %s2635_s28, %s2636_s9  }
 0x28a PF: > { %s1855_s30 = sand.u32 1, %s2614_s18   ;;  %p3150_p7 = scmp.ne.s32.totalorder %s3140_s25, 0 }
 0x28b   : > { %p3151_p9 = scmp.ge.s32.totalorder %s2626_s21, 2  ;;  %s1856_s17 = scalar_lea.sflag [#allocation5], %s1855_s30 }
 0x28d   : > { %p2422_p12 = pnand %p3151_p9, %p3150_p7 }
 0x28f   : > { %2609 = dma.done.wait (!%p2422_p12), %s1856_s17, 1024  }
 0x290   : > { %2611 = vsyncadd (!%p2422_p12), %s1856_s17, 4294966272  ;;  %p19_p1 = scmp.ge.s32.totalorder %s2783_s29, 4   ;;  %s3152_s18 = smov %s2618_s19 }
 0x291   : > { %s3153_s19 = smov %s2622_s20  ;;  %s3154_s20 = smov %s2799_s27 }
 0x292   : > { %s3155_s21 = smov %s2783_s29  ;;  %21 = sbr.rel (!%p19_p1) target bundleno = 6 (0x6), region = 104 }
 0x299   :  { %1861 = vsyncpa [#allocation4], 1 }
 0x29a   :  { %1863 = vsyncpa [#allocation4 + $0x1], 1 }
 0x29b   :  { %1864 = vsyncpa [#allocation7], 1 }
 0x29c   :  { %1865 = vsyncpa [#allocation5], 1 }
 0x29d   :  { %1867 = vsyncpa [#allocation5 + $0x1], 1 }

</bundles_post_ra>
